<compile_context>
chip_gen: v7x
topology: tpu7x:2x2x1
jax: 0.10.0
libtpu: 0.0.40
codegen_flags: <defaults>
</compile_context>

<pallas_src>
import jax
import jax.numpy as jnp
from jax.experimental import pallas as pl
from jax.experimental.pallas import tpu as pltpu


def _round_up(x, m):
    return ((x + m - 1) // m) * m


def _pick_h_tile(H):
    for cand in (512, 256, 128):
        if H % cand == 0:
            return cand
    # TODO(synk): pad H (and slice the output) for hidden sizes not divisible
    # by 128; for now small/odd H falls back to a single full-width tile.
    return H


def residual_linear_kernel(xb_ref, w_ref, b_ref, r_ref, o_ref):
    # grid = (i over M tiles, j over N tiles, k over K tiles); k is innermost.
    # xb_ref: (tm, tk) bf16  x[i-tile, k-slice]   (MXU LHS stream)
    # w_ref : (tk, tn) bf16  W[k-slice, j-slice]
    # b_ref : (1,  tn) f32   b[j-slice]
    # r_ref : (tm, tn) f32   x[i-tile, j-slice]   (residual; block index is
    #                                              constant across k -> one DMA
    #                                              per (i, j) output tile)
    # o_ref : (tm, tn) f32   out[i-tile, j-slice] (resident across k; used as
    #                                              the accumulator directly)
    k = pl.program_id(2)

    prod = jnp.dot(xb_ref[...], w_ref[...], preferred_element_type=jnp.float32)

    @pl.when(k == 0)
    def _():
        # Fold bias + residual into the first K step: no zero-init pass and no
        # separate read-modify-write epilogue at k == last.
        o_ref[...] = prod + b_ref[...] + r_ref[...]

    @pl.when(k > 0)
    def _():
        o_ref[...] += prod


def residual_linear(x_flat, w, b, *, tm_max=1024, th=None):
    M, K = x_flat.shape
    Kw, N = w.shape
    assert K == Kw == N, "Residual(Linear) requires a square hidden->hidden weight"
    H = K
    assert x_flat.dtype == jnp.float32, (
        "kernel accumulates matmul partials directly into the f32 output"
    )
    out_dtype = jnp.float32

    th = _pick_h_tile(H) if th is None else th
    assert H % th == 0, "hidden must be a multiple of the H tile"

    # Row tile: largest multiple of 16 (bf16 sublane packing) up to tm_max.
    tm = min(tm_max, _round_up(M, 16))
    M_pad = _round_up(M, tm)
    if M_pad != M:
        x_f32 = jnp.zeros((M_pad, H), jnp.float32).at[:M].set(x_flat)
    else:
        x_f32 = x_flat

    x_bf16 = x_f32.astype(jnp.bfloat16)          # MXU LHS: half the re-read bytes
    w_bf16 = w.astype(jnp.bfloat16)              # bf16 MXU path, half the W traffic
    # TODO(synk): on v7x, optionally quantize W to fp8 (e4m3) for another 2x on
    # the dominant W stream (keep the f32 accumulation).
    b2d = b.reshape(1, H).astype(jnp.float32)

    n_m, n_j, n_k = M_pad // tm, H // th, H // th
    grid = (n_m, n_j, n_k)

    cost = pl.CostEstimate(
        flops=2 * M_pad * H * H + 2 * M_pad * H,
        transcendentals=0,
        bytes_accessed=(
            n_j * x_bf16.size * 2          # bf16 LHS re-read once per j tile
            + x_f32.size * 4               # f32 residual, read exactly once
            + n_m * w_bf16.size * 2        # W re-streamed once per i tile
            + b2d.size * 4
            + M_pad * H * 4                # output write
        ),
    )

    out = pl.pallas_call(
        residual_linear_kernel,
        out_shape=jax.ShapeDtypeStruct((M_pad, H), out_dtype),
        grid_spec=pltpu.PrefetchScalarGridSpec(
            num_scalar_prefetch=0,
            grid=grid,
            in_specs=[
                pl.BlockSpec((tm, th), lambda i, j, k: (i, k)),   # bf16 LHS
                pl.BlockSpec((th, th), lambda i, j, k: (k, j)),   # bf16 W tile
                pl.BlockSpec((1, th), lambda i, j, k: (0, j)),    # f32 bias tile
                pl.BlockSpec((tm, th), lambda i, j, k: (i, j)),   # f32 residual
            ],
            out_specs=pl.BlockSpec((tm, th), lambda i, j, k: (i, j)),
        ),
        compiler_params=pltpu.CompilerParams(
            dimension_semantics=("parallel", "parallel", "arbitrary"),
            vmem_limit_bytes=48 * 1024 * 1024,   # v7x-safe (64 MiB physical VMEM)
        ),
        cost_estimate=cost,
    )(x_bf16, w_bf16, b2d, x_f32)

    return out[:M]


def residual_apply(x, w, b):
    """Residual(Linear)(x): shape-preserving, matches PyTorch fn(x) + x."""
    batch, seq, hidden = x.shape
    x_flat = x.reshape(batch * seq, hidden)
    out = residual_linear(x_flat, w, b)
    return out.reshape(batch, seq, hidden)


if __name__ == "__main__":
    key = jax.random.PRNGKey(0)
    k_x, k_w, k_b = jax.random.split(key, 3)

    batch, seq, hidden = 2, 8, 256   # small, but hidden=256 exercises full th tile
    x = jax.random.normal(k_x, (batch, seq, hidden), dtype=jnp.float32)
    # deterministic "Linear(hidden, hidden)" parameters
    w = jax.random.normal(k_w, (hidden, hidden), dtype=jnp.float32) * 0.02
    b = jax.random.normal(k_b, (hidden,), dtype=jnp.float32) * 0.02

    out = jax.block_until_ready(residual_apply(x, w, b))

    # pure-JAX reference with the same bf16 matmul operands / f32 accumulation:
    # Residual(fn)(x) = fn(x) + x
    xb = x.astype(jnp.bfloat16)
    wb = w.astype(jnp.bfloat16)
    ref = (
        jnp.einsum("bsh,hk->bsk", xb, wb, preferred_element_type=jnp.float32)
        + b
        + x
    )
    assert out.shape == x.shape and out.dtype == x.dtype
    assert jnp.allclose(out, ref, atol=1e-3, rtol=1e-3)

    print("KERNEL_OK")
</pallas_src>

<mosaic_0001>
module attributes {stable_mosaic.version = 11 : i64} {
  func.func @residual_linear_kernel(%arg0: i32, %arg1: i32, %arg2: i32, %arg3: memref<16x256xbf16, #tpu.memory_space<vmem>>, %arg4: memref<256x256xbf16, #tpu.memory_space<vmem>>, %arg5: memref<1x256xf32, #tpu.memory_space<vmem>>, %arg6: memref<16x256xf32, #tpu.memory_space<vmem>>, %arg7: memref<16x256xf32, #tpu.memory_space<vmem>>) attributes {dimension_semantics = [#tpu.dimension_semantics<parallel>, #tpu.dimension_semantics<parallel>, #tpu.dimension_semantics<arbitrary>], iteration_bounds = array<i64: 1, 1, 1>, scalar_prefetch = 0 : i64, scratch_operands = 0 : i64, tpu.core_type = #tpu.core_type<tc>, window_params = [{transform_indices = @transform_0, window_bounds = array<i64: 16, 256>}, {transform_indices = @transform_1, window_bounds = array<i64: 256, 256>}, {transform_indices = @transform_2, window_bounds = array<i64: 1, 256>}, {transform_indices = @transform_3, window_bounds = array<i64: 16, 256>}, {transform_indices = @transform_4, window_bounds = array<i64: 16, 256>}]} {
    %c0 = arith.constant 0 : index
    %c0_0 = arith.constant 0 : index
    %0 = vector.load %arg3[%c0, %c0_0] : memref<16x256xbf16, #tpu.memory_space<vmem>>, vector<16x256xbf16>
    %c0_1 = arith.constant 0 : index
    %c0_2 = arith.constant 0 : index
    %1 = vector.load %arg4[%c0_1, %c0_2] : memref<256x256xbf16, #tpu.memory_space<vmem>>, vector<256x256xbf16>
    %cst = arith.constant dense<0.000000e+00> : vector<16x256xf32>
    %2 = tpu.matmul %0, %1, %cst {dimension_numbers = #tpu.dot_dimension_numbers<[1], [0], [0], [1], [0, 0, 1, 1], [], []>} : vector<16x256xbf16>, vector<256x256xbf16>, vector<16x256xf32> -> vector<16x256xf32>
    %c0_i32 = arith.constant 0 : i32
    %3 = arith.cmpi eq, %arg2, %c0_i32 : i32
    %4 = arith.extui %3 : i1 to i32
    %c0_i32_3 = arith.constant 0 : i32
    %5 = arith.cmpi ne, %4, %c0_i32_3 : i32
    scf.if %5 {
      %c0_6 = arith.constant 0 : index
      %c0_7 = arith.constant 0 : index
      %9 = vector.load %arg5[%c0_6, %c0_7] : memref<1x256xf32, #tpu.memory_space<vmem>>, vector<1x256xf32>
      %10 = vector.broadcast %9 : vector<1x256xf32> to vector<16x256xf32>
      %11 = arith.addf %2, %10 : vector<16x256xf32>
      %c0_8 = arith.constant 0 : index
      %c0_9 = arith.constant 0 : index
      %12 = vector.load %arg6[%c0_8, %c0_9] : memref<16x256xf32, #tpu.memory_space<vmem>>, vector<16x256xf32>
      %13 = arith.addf %11, %12 : vector<16x256xf32>
      %c0_10 = arith.constant 0 : index
      %c0_11 = arith.constant 0 : index
      %14 = vector.load %arg7[%c0_10, %c0_11] : memref<16x256xf32, #tpu.memory_space<vmem>>, vector<16x256xf32>
      tpu.vector_store %arg7[%c0_10, %c0_11], %13 {strides = array<i32>} : memref<16x256xf32, #tpu.memory_space<vmem>>, vector<16x256xf32>,
    } else {
    }
    %c0_i32_4 = arith.constant 0 : i32
    %6 = arith.cmpi sgt, %arg2, %c0_i32_4 : i32
    %7 = arith.extui %6 : i1 to i32
    %c0_i32_5 = arith.constant 0 : i32
    %8 = arith.cmpi ne, %7, %c0_i32_5 : i32
    scf.if %8 {
      %c0_6 = arith.constant 0 : index
      %c0_7 = arith.constant 0 : index
      %9 = vector.load %arg7[%c0_6, %c0_7] : memref<16x256xf32, #tpu.memory_space<vmem>>, vector<16x256xf32>
      %10 = arith.addf %9, %2 : vector<16x256xf32>
      %c0_8 = arith.constant 0 : index
      %c0_9 = arith.constant 0 : index
      %11 = vector.load %arg7[%c0_8, %c0_9] : memref<16x256xf32, #tpu.memory_space<vmem>>, vector<16x256xf32>
      tpu.vector_store %arg7[%c0_8, %c0_9], %10 {strides = array<i32>} : memref<16x256xf32, #tpu.memory_space<vmem>>, vector<16x256xf32>,
    } else {
    }
    return
  }
  func.func @transform_0(%arg0: i32, %arg1: i32, %arg2: i32) -> (i32, i32) {
    %c0_i32 = arith.constant 0 : i32
    return %arg0, %arg2 : i32, i32
  }
  func.func @transform_1(%arg0: i32, %arg1: i32, %arg2: i32) -> (i32, i32) {
    %c0_i32 = arith.constant 0 : i32
    return %arg2, %arg1 : i32, i32
  }
  func.func @transform_2(%arg0: i32, %arg1: i32, %arg2: i32) -> (i32, i32) {
    %c0_i32 = arith.constant 0 : i32
    %c0_i32_0 = arith.constant 0 : i32
    return %c0_i32, %arg1 : i32, i32
  }
  func.func @transform_3(%arg0: i32, %arg1: i32, %arg2: i32) -> (i32, i32) {
    %c0_i32 = arith.constant 0 : i32
    return %arg0, %arg1 : i32, i32
  }
  func.func @transform_4(%arg0: i32, %arg1: i32, %arg2: i32) -> (i32, i32) {
    %c0_i32 = arith.constant 0 : i32
    return %arg0, %arg1 : i32, i32
  }
}

</mosaic_0001>

<bundles_post_ra>
// kernel: tpu_custom_call.1
= control target key start
LH: loop header
LB: loop body
LE: loop exit
PB: predicated region body
PF: predicated region fallthrough
CT: control target
= control target key end

     0   :  { %9 = vsyncpa [#allocation3], 0  ;;  %s656_s0 = inlined_call_operand.hbm [shape: bf16[16,256], index: 0, kind: input, shape index: {}]   ;;  %s657_s1 = inlined_call_operand.hbm [shape: bf16[256,256], index: 1, kind: input, shape index: {}]   ;;  %s658_s2 = inlined_call_operand.vmem [shape: f32[1,256], index: 2, kind: input, shape index: {}]   ;;  %s659_s3 = inlined_call_operand.hbm [shape: f32[16,256], index: 3, kind: input, shape index: {}]   ;;  %s660_s4 = inlined_call_operand.hbm [shape: f32[16,256], index: 4, kind: output, shape index: {}]  }
   0x1   :  { %10 = vsyncpa [#allocation6], 0 }
   0x2   :  { %11 = vsyncpa [#allocation4], 0  ;;  %s559_s15 = smov [#allocation5]   ;;  %s560_s17 = smov [#allocation2]  }
   0x3   :  { %s29_s16 = sshll.u32 %s559_s15, 4  ;;  %s17_s18 = sshll.u32 %s560_s17, 4  ;;  %s30_s16 = int_to_ptr.vmem [resolvable:$true] %s29_s16  ;;  %s592_s18 = int_to_ptr.vmem [resolvable:$true] %s17_s18 }
   0x4   :  { %s465_s21 = scalar_lea.hbm %s657_s1, 4096 }
   0x5   :  { %p466_p0 = scmp.ne.s32.totalorder %s657_s1, %s465_s21  ;;  %p469_p1 = scmp.lt.u32.totalorder %s465_s21, %s657_s1 }
   0x7   :  { %p471_p2 = pnand %p469_p1, %p466_p0 }
   0x9   :  { %474 = shalt.err (!%p471_p2)
}
   0xa   :  { %s475_s26 = scalar_lea.vmem %s30_s16, 4096  ;;  %p480_p4 = scmp.lt.s32.totalorder %s30_s16, %s30_s16 }
   0xb   :  { %p476_p3 = scmp.ne.s32.totalorder %s30_s16, %s475_s26  ;;  %p481_p5 = scmp.lt.s32.totalorder %s475_s26, %s475_s26 }
   0xd   :  { %p482_p6 = por %p481_p5, %p480_p4 }
   0xf   :  { %p483_p7 = pnand %p482_p6, %p476_p3 }
  0x11   :  { %486 = shalt.err (!%p483_p7)
}
  0x12   :  { %s561_s27 = smov 128   ;;  %s562_s28 = smov 8  }
  0x13   :  { %35 = dma.hbm_to_vmem [thread:$0]  %s657_s1, 4096, %s30_s16, [#allocation6], %s561_s27, %s561_s27, %s562_s28  }
  0x14   :  { %s487_s7 = scalar_lea.hbm %s656_s0, 256 }
  0x15   :  { %p488_p8 = scmp.ne.s32.totalorder %s656_s0, %s487_s7  ;;  %p491_p9 = scmp.lt.u32.totalorder %s487_s7, %s656_s0 }
  0x17   :  { %p493_p10 = pnand %p491_p9, %p488_p8 }
  0x19   :  { %496 = shalt.err (!%p493_p10)
}
  0x1a   :  { %s497_s12 = scalar_lea.vmem %s592_s18, 256  ;;  %p502_p12 = scmp.lt.s32.totalorder %s592_s18, %s592_s18 }
  0x1b   :  { %p498_p11 = scmp.ne.s32.totalorder %s592_s18, %s497_s12  ;;  %p503_p13 = scmp.lt.s32.totalorder %s497_s12, %s497_s12 }
  0x1d   :  { %p504_p0 = por %p503_p13, %p502_p12 }
  0x1f   :  { %p505_p1 = pnand %p504_p0, %p498_p11 }
  0x21   :  { %508 = shalt.err (!%p505_p1)
}
  0x22   :  { %23 = dma.hbm_to_vmem [thread:$0]  %s656_s0, 256, %s592_s18, [#allocation3], %s561_s27, %s561_s27, %s562_s28  }
  0x23   :  { %s563_s14 = smov [#allocation7]   ;;  %s509_s19 = scalar_lea.hbm %s659_s3, 512 }
  0x24   :  { %s43_s15 = sshll.u32 %s563_s14, 4  ;;  %p510_p2 = scmp.ne.s32.totalorder %s659_s3, %s509_s19  ;;  %s44_s15 = int_to_ptr.vmem [resolvable:$true] %s43_s15 }
  0x25   :  { %p513_p3 = scmp.lt.u32.totalorder %s509_s19, %s659_s3 }
  0x27   :  { %p515_p4 = pnand %p513_p3, %p510_p2 }
  0x29   :  { %518 = shalt.err (!%p515_p4)
}
  0x2a   :  { %s519_s24 = scalar_lea.vmem %s44_s15, 512  ;;  %p524_p6 = scmp.lt.s32.totalorder %s44_s15, %s44_s15 }
  0x2b   :  { %p520_p5 = scmp.ne.s32.totalorder %s44_s15, %s519_s24  ;;  %p525_p7 = scmp.lt.s32.totalorder %s519_s24, %s519_s24 }
  0x2d   :  { %p526_p8 = por %p525_p7, %p524_p6 }
  0x2f   :  { %p527_p9 = pnand %p526_p8, %p520_p5 }
  0x31   :  { %530 = shalt.err (!%p527_p9)
}
  0x32   :  { %s564_s0 = smov 256   ;;  %s565_s18 = smov 16  }
  0x33   :  { %49 = dma.hbm_to_vmem [thread:$0]  %s659_s3, 512, %s44_s15, [#allocation6], %s564_s0, %s564_s0, %s565_s18  }
  0x34   :  { %553 = dma.done.wait [#allocation3], 256  }
  0x35   :  { %554 = vsyncadd [#allocation3], 4294967040 }
  0x36   :  { %555 = dma.done.wait [#allocation6], 4608  }
  0x37   :  { %556 = vsyncadd [#allocation6], 4294962688  ;;  %v414_v0 = vld [vmem:[#allocation5 + $0x4] ss:$8 sps:$4 sm:$0xff]   ;;  %v416_v1 = vld [vmem:[#allocation5] ss:$8 sps:$4 sm:$0xff]   ;;  %v312_v34 = vlaneseq }
  0x38   :  { %263 = vmatprep.subr.bf16.mxu0 %v414_v0  ;;  %v417_v2 = vld [vmem:[#allocation5 + $0x14] ss:$8 sps:$4 sm:$0xff]   ;;  %v419_v3 = vld [vmem:[#allocation5 + $0x10] ss:$8 sps:$4 sm:$0xff]   ;;  %v420_v4 = vld [vmem:[#allocation5 + $0x24] ss:$8 sps:$4 sm:$0xff]  }
  0x39   :  { %264 = vmatpush1.bf16.msra.mxu0 %v416_v1  ;;  %v422_v5 = vld [vmem:[#allocation5 + $0x20] ss:$8 sps:$4 sm:$0xff]   ;;  %v423_v6 = vld [vmem:[#allocation5 + $0x34] ss:$8 sps:$4 sm:$0xff]   ;;  %v425_v7 = vld [vmem:[#allocation5 + $0x30] ss:$8 sps:$4 sm:$0xff]  }
  0x3a   :  { %265 = vmatprep.subr.bf16.mxu0 %v417_v2  ;;  %v426_v8 = vld [vmem:[#allocation5 + $0x44] ss:$8 sps:$4 sm:$0xff]   ;;  %v428_v9 = vld [vmem:[#allocation5 + $0x40] ss:$8 sps:$4 sm:$0xff]   ;;  %v429_v10 = vld [vmem:[#allocation5 + $0x54] ss:$8 sps:$4 sm:$0xff]  }
  0x3b   :  { %v431_v11 = vld [vmem:[#allocation5 + $0x50] ss:$8 sps:$4 sm:$0xff]   ;;  %v432_v12 = vld [vmem:[#allocation5 + $0x64] ss:$8 sps:$4 sm:$0xff]   ;;  %v464_v13 = vld [vmem:[#allocation2 + $0x4] ss:$8 sps:$4 sm:$0xff]  }
  0x3c   :  { %v434_v14 = vld [vmem:[#allocation5 + $0x60] ss:$8 sps:$4 sm:$0xff]   ;;  %v435_v15 = vld [vmem:[#allocation5 + $0x74] ss:$8 sps:$4 sm:$0xff]   ;;  %295 = vmatprep.mubr.bf16.mxu0 %v464_v13  ;;  %v437_v16 = vld [vmem:[#allocation5 + $0x70] ss:$8 sps:$4 sm:$0xff]  }
  0x3d   :  { %266 = vmatpush1.bf16.msra.mxu0 %v419_v3  ;;  %v438_v17 = vld [vmem:[#allocation5 + $0x84] ss:$8 sps:$4 sm:$0xff]   ;;  %v440_v18 = vld [vmem:[#allocation5 + $0x80] ss:$8 sps:$4 sm:$0xff]   ;;  %v441_v19 = vld [vmem:[#allocation5 + $0x94] ss:$8 sps:$4 sm:$0xff]  }
  0x3e   :  { %267 = vmatprep.subr.bf16.mxu0 %v420_v4  ;;  %v443_v20 = vld [vmem:[#allocation5 + $0x90] ss:$8 sps:$4 sm:$0xff]   ;;  %v444_v21 = vld [vmem:[#allocation5 + $0xa4] ss:$8 sps:$4 sm:$0xff]   ;;  %v446_v22 = vld [vmem:[#allocation5 + $0xa0] ss:$8 sps:$4 sm:$0xff]  }
  0x3f   :  { %v447_v23 = vld [vmem:[#allocation5 + $0xb4] ss:$8 sps:$4 sm:$0xff]   ;;  %v449_v24 = vld [vmem:[#allocation5 + $0xb0] ss:$8 sps:$4 sm:$0xff]   ;;  %v450_v25 = vld [vmem:[#allocation5 + $0xc4] ss:$8 sps:$4 sm:$0xff]  }
  0x40   :  { %v452_v26 = vld [vmem:[#allocation5 + $0xc0] ss:$8 sps:$4 sm:$0xff]   ;;  %v453_v27 = vld [vmem:[#allocation5 + $0xd4] ss:$8 sps:$4 sm:$0xff]   ;;  %v455_v28 = vld [vmem:[#allocation5 + $0xd0] ss:$8 sps:$4 sm:$0xff]  }
  0x41   :  { %268 = vmatpush1.bf16.msra.mxu0 %v422_v5  ;;  %v456_v29 = vld [vmem:[#allocation5 + $0xe4] ss:$8 sps:$4 sm:$0xff]   ;;  %v458_v30 = vld [vmem:[#allocation5 + $0xe0] ss:$8 sps:$4 sm:$0xff]   ;;  %v459_v31 = vld [vmem:[#allocation5 + $0xf4] ss:$8 sps:$4 sm:$0xff]  }
  0x42   :  { %269 = vmatprep.subr.bf16.mxu0 %v423_v6  ;;  %v461_v32 = vld [vmem:[#allocation5 + $0xf0] ss:$8 sps:$4 sm:$0xff]   ;;  %v313_v35 = vshrl.u32 %v312_v34, 7  ;;  %v326_v42 = vld [vmem:[#allocation7] sm:$0xff]  ;;  %v327_v45 = vld [vmem:[#allocation7 + $0x8] sm:$0xff]  ;;  %s566_s28 = smov [#allocation8]  }
  0x43   :  { %v462_v33 = vld [vmem:[#allocation2] ss:$8 sps:$4 sm:$0xff]   ;;  %s359_s29 = sshll.u32 %s566_s28, 4  ;;  %s360_s29 = int_to_ptr.vmem [resolvable:$true] %s359_s29 }
  0x44   :  { %v314_v36 = vsub.s32 0, %v313_v35  ;;  %v310_v37 = vld [vmem:[%s658_s2] sm:$0x3]  ;;  %v318_v38 = vsub.s32 1, %v313_v35  ;;  %v329_v52 = vld [vmem:[#allocation7 + $0x18] sm:$0xff]  ;;  %s531_s2 = scalar_lea.vmem %s360_s29, 512  ;;  %p536_p11 = scmp.lt.s32.totalorder %s360_s29, %s360_s29 }
  0x45   :  { %270 = vmatpush1.bf16.msra.mxu0 %v425_v7  ;;  %v328_v48 = vld [vmem:[#allocation7 + $0x10] sm:$0xff]  ;;  %p532_p10 = scmp.ne.s32.totalorder %s360_s29, %s531_s2  ;;  %p537_p12 = scmp.lt.s32.totalorder %s531_s2, %s531_s2 }
  0x46   :  { %271 = vmatprep.subr.bf16.mxu0 %v426_v8  ;;  %v315_v39 = vrot.slane %v310_v37, %v314_v36  ;;  %v319_v40 = vrot.slane %v310_v37, %v318_v38 }
  0x47   :  { %p538_p13 = por %p537_p12, %p536_p11 }
  0x49   :  { %272 = vmatpush1.bf16.msra.mxu0 %v428_v9  ;;  %p539_p0 = pnand %p538_p13, %p532_p10 }
  0x4a   :  { %273 = vmatprep.subr.bf16.mxu0 %v429_v10 }
  0x4d   :  { %274 = vmatpush1.bf16.msra.mxu0 %v431_v11 }
  0x4e   :  { %275 = vmatprep.subr.bf16.mxu0 %v432_v12 }
  0x51   :  { %276 = vmatpush1.bf16.msra.mxu0 %v434_v14 }
  0x52   :  { %277 = vmatprep.subr.bf16.mxu0 %v435_v15 }
  0x55   :  { %278 = vmatpush1.bf16.msra.mxu0 %v437_v16 }
  0x56   :  { %279 = vmatprep.subr.bf16.mxu0 %v438_v17 }
  0x59   :  { %280 = vmatpush1.bf16.msra.mxu0 %v440_v18 }
  0x5a   :  { %281 = vmatprep.subr.bf16.mxu0 %v441_v19 }
  0x5d   :  { %282 = vmatpush1.bf16.msra.mxu0 %v443_v20 }
  0x5e   :  { %283 = vmatprep.subr.bf16.mxu0 %v444_v21 }
  0x61   :  { %284 = vmatpush1.bf16.msra.mxu0 %v446_v22 }
  0x62   :  { %285 = vmatprep.subr.bf16.mxu0 %v447_v23 }
  0x65   :  { %286 = vmatpush1.bf16.msra.mxu0 %v449_v24 }
  0x66   :  { %287 = vmatprep.subr.bf16.mxu0 %v450_v25 }
  0x69   :  { %288 = vmatpush1.bf16.msra.mxu0 %v452_v26 }
  0x6a   :  { %289 = vmatprep.subr.bf16.mxu0 %v453_v27 }
  0x6d   :  { %290 = vmatpush1.bf16.msra.mxu0 %v455_v28 }
  0x6e   :  { %291 = vmatprep.subr.bf16.mxu0 %v456_v29 }
  0x71   :  { %292 = vmatpush1.bf16.msra.mxu0 %v458_v30 }
  0x72   :  { %293 = vmatprep.subr.bf16.mxu0 %v459_v31 }
  0x75   :  { %294 = vmatpush1.bf16.msra.mxu0 %v461_v32 }
  0x78   :  { %296 = vmatmul.mubr.bf16.vlgmr.msra.gmra.mrb[0].mxu0 %v462_v33 }
 0x14b   :  { %v297_v41 = vpop.f32.mrb[0].mxu0 }
 0x14c   :  { %v322_v43 = vadd.f32 %v315_v39, %v297_v41  ;;  %v299_v44 = vpop.f32.mrb[1].mxu0 }
 0x14d   :  { %v323_v46 = vadd.f32 %v319_v40, %v299_v44  ;;  %v301_v47 = vpop.f32.mrb[2].mxu0 }
 0x14e   :  { %v330_v49 = vadd.f32 %v326_v42, %v322_v43  ;;  %v324_v50 = vadd.f32 %v315_v39, %v301_v47  ;;  %v303_v51 = vpop.f32.mrb[3].mxu0 }
 0x14f   :  { %v331_v53 = vadd.f32 %v327_v45, %v323_v46  ;;  %v325_v54 = vadd.f32 %v319_v40, %v303_v51 }
 0x150   :  { %334 = vst [vmem:[#allocation8] sm:$0xff] %v330_v49  ;;  %v332_v55 = vadd.f32 %v328_v48, %v324_v50 }
 0x151   :  { %335 = vst [vmem:[#allocation8 + $0x8] sm:$0xff] %v331_v53  ;;  %v333_v56 = vadd.f32 %v329_v52, %v325_v54 }
 0x152   :  { %336 = vst [vmem:[#allocation8 + $0x10] sm:$0xff] %v332_v55 }
 0x153   :  { %337 = vst [vmem:[#allocation8 + $0x18] sm:$0xff] %v333_v56 }
 0x154   :  { %542 = shalt.err (!%p539_p0)
}
 0x155   :  { %s543_s6 = scalar_lea.hbm %s660_s4, 512 }
 0x156   :  { %p544_p1 = scmp.ne.s32.totalorder %s660_s4, %s543_s6  ;;  %p547_p2 = scmp.lt.u32.totalorder %s543_s6, %s660_s4 }
 0x158   :  { %p549_p3 = pnand %p547_p2, %p544_p1 }
 0x15a   :  { %552 = shalt.err (!%p549_p3)
}
 0x15b   :  { %365 = dma.vmem_to_hbm [thread:$0]  %s360_s29, 512, %s660_s4, [#allocation4], %s564_s0, %s564_s0, %s565_s18  }
 0x15c   :  { %557 = dma.done.wait [#allocation4], 512  }
 0x15d   :  { %558 = vsyncadd [#allocation4], 4294966784 }
 0x15e   :  { %369 = vsyncpa [#allocation3], 1 }
 0x15f   :  { %370 = vsyncpa [#allocation6], 1 }
 0x160   :  { %371 = vsyncpa [#allocation4], 1 }

</bundles_post_ra>
